<compile_context>
chip_gen: v5e
topology: v5e:2x2
jax: 0.10.0
libtpu: 0.0.40
codegen_flags: <defaults>
</compile_context>

<pallas_src>
import functools

import jax
import jax.numpy as jnp
from jax.experimental import pallas as pl
from jax.experimental.pallas import tpu as pltpu


def _round_up(x: int, m: int) -> int:
    return ((x + m - 1) // m) * m


# ---------------------------------------------------------------------------
# Kernel
# ---------------------------------------------------------------------------
def highway_kernel(x_ref, wp_ref, bp_ref, wg_ref, bg_ref, o_ref, *, mxu_dtype):
    """One (TB, E) batch tile.

    x_ref : (TB, E)  input tile (kept in its storage dtype for the DMA)
    wp_ref: (E, E)   Wproj.T, resident in VMEM (constant index_map)
    bp_ref: (1, E)   bproj, f32
    wg_ref: (E, E)   Wgate.T, resident in VMEM
    bg_ref: (1, E)   bgate, f32
    o_ref : (TB, E)  output tile
    """
    x = x_ref[...]
    xf = x.astype(jnp.float32)           # f32 copy for the highway combine
    xm = x.astype(mxu_dtype)             # MXU operand, same dtype as weights

    # proj branch first; it is the only f32 intermediate that must stay live
    # across the second matmul (smaller live set -> less spill).
    proj = jnp.dot(xm, wp_ref[...], preferred_element_type=jnp.float32)
    proj = jnp.maximum(proj + bp_ref[...], 0.0)          # relu (VPU)

    # gate branch, folded straight into the combine.
    gate = jnp.dot(xm, wg_ref[...], preferred_element_type=jnp.float32)
    gate = jax.nn.sigmoid(gate + bg_ref[...])             # exp on EUP

    o_ref[...] = (xf + gate * (proj - xf)).astype(o_ref.dtype)


# ---------------------------------------------------------------------------
# One-time parameter preparation (hoisted out of the per-call path)
# ---------------------------------------------------------------------------
def prepare_highway_params(wproj, bproj, wgate, bgate, mxu_dtype=jnp.bfloat16):
    """Transpose PyTorch (out, in) weights to (in, out), store them in the
    MXU dtype (bf16 by default for f32 models), keep biases in f32.
    No zero padding anywhere (K is not padded; the lane dim is the true E)."""
    wp_t = jnp.asarray(wproj).T.astype(mxu_dtype)          # (E, E)
    wg_t = jnp.asarray(wgate).T.astype(mxu_dtype)          # (E, E)
    bp = jnp.asarray(bproj).astype(jnp.float32).reshape(1, -1)
    bg = jnp.asarray(bgate).astype(jnp.float32).reshape(1, -1)
    return wp_t, bp, wg_t, bg


# ---------------------------------------------------------------------------
# Forward wrapper (zero-copy: no pad, no un-pad slice)
# ---------------------------------------------------------------------------
@functools.partial(jax.jit, static_argnames=("tb",))
def highway_forward(x, wp_t, bp, wg_t, bg, *, tb=512):
    """x: (..., E).  wp_t/wg_t: (E, E) in the MXU dtype.  bp/bg: (1, E) f32."""
    E = wp_t.shape[0]
    lead_shape = x.shape[:-1]
    x2 = x.reshape(-1, E)
    B = x2.shape[0]

    # Sublane-aligned batch tile; capped near B/2 so the parallel batch axis
    # has >= 2 grid steps whenever B allows it (v7x megacore sharding).
    TB = min(_round_up(tb, 8), max(8, _round_up(pl.cdiv(B, 2), 8)))
    grid = (pl.cdiv(B, TB),)            # ragged last tile handled by Pallas;
                                        # no cross-row reduction, so garbage
                                        # rows in the tail tile are harmless.

    itm_x = x2.dtype.itemsize
    itm_w = wp_t.dtype.itemsize
    # Budget: resident weights (worst case x2 buffers), double-buffered x and
    # out tiles, biases, and the f32 epilogue intermediates.
    vmem_need = (2 * 2 * E * E * itm_w
                 + 2 * TB * E * itm_x            # x tiles
                 + 2 * TB * E * itm_x            # out tiles
                 + 4 * E * 4                     # biases (f32)
                 + 3 * TB * E * 4)               # proj / gate / xf in f32
    vmem_limit = int(min(max(2 * vmem_need, 32 * 1024 * 1024),
                         56 * 1024 * 1024))
    # NOTE: for very large E (f32 weight footprint >~ VMEM), switch to an
    # N-tiled second grid axis for the weights instead of resident blocks.

    rows = grid[0] * TB
    cost = pl.CostEstimate(
        flops=2 * rows * E * E * 2,              # two (TB,E)x(E,E) matmuls
        transcendentals=rows * E,                # sigmoid -> exp on the EUP
        bytes_accessed=(x2.size * itm_x + B * E * itm_x
                        + 2 * E * E * itm_w + 2 * E * 4),
    )

    kernel = functools.partial(highway_kernel, mxu_dtype=wp_t.dtype)

    out = pl.pallas_call(
        kernel,
        out_shape=jax.ShapeDtypeStruct((B, E), x.dtype),
        grid=grid,
        in_specs=[
            pl.BlockSpec((TB, E), lambda i: (i, 0)),   # x: batch-tiled
            pl.BlockSpec((E, E), lambda i: (0, 0)),    # Wproj.T: resident
            pl.BlockSpec((1, E), lambda i: (0, 0)),    # bproj:   resident
            pl.BlockSpec((E, E), lambda i: (0, 0)),    # Wgate.T: resident
            pl.BlockSpec((1, E), lambda i: (0, 0)),    # bgate:   resident
        ],
        out_specs=pl.BlockSpec((TB, E), lambda i: (i, 0)),
        compiler_params=pltpu.CompilerParams(
            dimension_semantics=("parallel",),
            vmem_limit_bytes=vmem_limit,
        ),
        cost_estimate=cost,
    )(x2, wp_t, bp, wg_t, bg)

    return out.reshape(*lead_shape, E)


# ---------------------------------------------------------------------------
# Pure-JAX reference matching the PyTorch forward
# ---------------------------------------------------------------------------
def highway_ref(x, wproj, bproj, wgate, bgate):
    proj = jax.nn.relu(x @ wproj.T + bproj)
    gate = jax.nn.sigmoid(x @ wgate.T + bgate)
    return gate * proj + (1.0 - gate) * x


if __name__ == "__main__":
    B = 8                 # batch of words
    E = 32                # word_embed_size

    key = jax.random.PRNGKey(0)
    kx, kwp, kbp, kwg, kbg = jax.random.split(key, 5)

    x = jax.random.normal(kx, (B, E), dtype=jnp.float32)
    # PyTorch Linear shapes: weight (out, in), bias (out,)
    wproj = jax.random.normal(kwp, (E, E), dtype=jnp.float32) * 0.1
    bproj = jax.random.normal(kbp, (E,), dtype=jnp.float32) * 0.1
    wgate = jax.random.normal(kwg, (E, E), dtype=jnp.float32) * 0.1
    bgate = jax.random.normal(kbg, (E,), dtype=jnp.float32) * 0.1

    ref = highway_ref(x, wproj, bproj, wgate, bgate)

    # Default fast path: bf16 MXU operands, f32 accumulation / combine.
    params_bf16 = prepare_highway_params(wproj, bproj, wgate, bgate)
    out = jax.block_until_ready(highway_forward(x, *params_bf16))
    assert out.shape == (B, E)
    assert out.dtype == x.dtype
    err = float(jnp.max(jnp.abs(out - ref)))
    assert err < 4e-2, f"bf16-MXU path mismatch vs reference: max abs err {err}"

    # Full-f32 MXU path: must match the reference tightly.
    params_f32 = prepare_highway_params(wproj, bproj, wgate, bgate,
                                        mxu_dtype=jnp.float32)
    out32 = jax.block_until_ready(highway_forward(x, *params_f32))
    assert jnp.allclose(out32, ref, atol=1e-5, rtol=1e-5), "f32 path mismatch"

    print("KERNEL_OK")
</pallas_src>

<mosaic_0001>
module attributes {stable_mosaic.version = 11 : i64} {
  func.func @highway_kernel(%arg0: i32, %arg1: memref<8x32xf32, #tpu.memory_space<vmem>>, %arg2: memref<32x32xbf16, #tpu.memory_space<vmem>>, %arg3: memref<1x32xf32, #tpu.memory_space<vmem>>, %arg4: memref<32x32xbf16, #tpu.memory_space<vmem>>, %arg5: memref<1x32xf32, #tpu.memory_space<vmem>>, %arg6: memref<8x32xf32, #tpu.memory_space<vmem>>) attributes {dimension_semantics = [#tpu.dimension_semantics<parallel>], iteration_bounds = array<i64: 1>, scalar_prefetch = 0 : i64, scratch_operands = 0 : i64, tpu.core_type = #tpu.core_type<tc>, window_params = [{transform_indices = @transform_0, window_bounds = array<i64: 8, 32>}, {pipeline_mode = #tpu.pipeline_mode<synchronous>, transform_indices = @transform_1, window_bounds = array<i64: 32, 32>}, {pipeline_mode = #tpu.pipeline_mode<synchronous>, transform_indices = @transform_2, window_bounds = array<i64: 1, 32>}, {pipeline_mode = #tpu.pipeline_mode<synchronous>, transform_indices = @transform_3, window_bounds = array<i64: 32, 32>}, {pipeline_mode = #tpu.pipeline_mode<synchronous>, transform_indices = @transform_4, window_bounds = array<i64: 1, 32>}, {transform_indices = @transform_5, window_bounds = array<i64: 8, 32>}]} {
    %c0 = arith.constant 0 : index
    %c0_0 = arith.constant 0 : index
    %0 = vector.load %arg1[%c0, %c0_0] : memref<8x32xf32, #tpu.memory_space<vmem>>, vector<8x32xf32>
    %1 = arith.truncf %0 : vector<8x32xf32> to vector<8x32xbf16>
    %c0_1 = arith.constant 0 : index
    %c0_2 = arith.constant 0 : index
    %2 = vector.load %arg2[%c0_1, %c0_2] : memref<32x32xbf16, #tpu.memory_space<vmem>>, vector<32x32xbf16>
    %cst = arith.constant dense<0.000000e+00> : vector<8x32xf32>
    %3 = tpu.matmul %1, %2, %cst {dimension_numbers = #tpu.dot_dimension_numbers<[1], [0], [0], [1], [0, 0, 1, 1], [], []>} : vector<8x32xbf16>, vector<32x32xbf16>, vector<8x32xf32> -> vector<8x32xf32>
    %c0_3 = arith.constant 0 : index
    %c0_4 = arith.constant 0 : index
    %4 = vector.load %arg3[%c0_3, %c0_4] : memref<1x32xf32, #tpu.memory_space<vmem>>, vector<1x32xf32>
    %5 = vector.broadcast %4 : vector<1x32xf32> to vector<8x32xf32>
    %6 = arith.addf %3, %5 : vector<8x32xf32>
    %cst_5 = arith.constant 0.000000e+00 : f32
    %7 = vector.broadcast %cst_5 : f32 to vector<8x32xf32>
    %8 = arith.maximumf %6, %7 : vector<8x32xf32>
    %c0_6 = arith.constant 0 : index
    %c0_7 = arith.constant 0 : index
    %9 = vector.load %arg4[%c0_6, %c0_7] : memref<32x32xbf16, #tpu.memory_space<vmem>>, vector<32x32xbf16>
    %cst_8 = arith.constant dense<0.000000e+00> : vector<8x32xf32>
    %10 = tpu.matmul %1, %9, %cst_8 {dimension_numbers = #tpu.dot_dimension_numbers<[1], [0], [0], [1], [0, 0, 1, 1], [], []>} : vector<8x32xbf16>, vector<32x32xbf16>, vector<8x32xf32> -> vector<8x32xf32>
    %c0_9 = arith.constant 0 : index
    %c0_10 = arith.constant 0 : index
    %11 = vector.load %arg5[%c0_9, %c0_10] : memref<1x32xf32, #tpu.memory_space<vmem>>, vector<1x32xf32>
    %12 = vector.broadcast %11 : vector<1x32xf32> to vector<8x32xf32>
    %13 = arith.addf %10, %12 : vector<8x32xf32>
    %14 = arith.negf %13 : vector<8x32xf32>
    %15 = math.exp %14 : vector<8x32xf32>
    %cst_11 = arith.constant 1.000000e+00 : f32
    %16 = vector.broadcast %cst_11 : f32 to vector<8x32xf32>
    %17 = arith.addf %16, %15 : vector<8x32xf32>
    %18 = arith.divf %16, %17 : vector<8x32xf32>
    %19 = arith.subf %8, %0 : vector<8x32xf32>
    %20 = arith.mulf %18, %19 : vector<8x32xf32>
    %21 = arith.addf %0, %20 : vector<8x32xf32>
    %c0_12 = arith.constant 0 : index
    %c0_13 = arith.constant 0 : index
    %22 = vector.load %arg6[%c0_12, %c0_13] : memref<8x32xf32, #tpu.memory_space<vmem>>, vector<8x32xf32>
    tpu.vector_store %arg6[%c0_12, %c0_13], %21 {strides = array<i32>} : memref<8x32xf32, #tpu.memory_space<vmem>>, vector<8x32xf32>,
    return
  }
  func.func @transform_0(%arg0: i32) -> (i32, i32) {
    %c0_i32 = arith.constant 0 : i32
    %c0_i32_0 = arith.constant 0 : i32
    return %arg0, %c0_i32 : i32, i32
  }
  func.func @transform_1(%arg0: i32) -> (i32, i32) {
    %c0_i32 = arith.constant 0 : i32
    %c0_i32_0 = arith.constant 0 : i32
    %c0_i32_1 = arith.constant 0 : i32
    return %c0_i32, %c0_i32_0 : i32, i32
  }
  func.func @transform_2(%arg0: i32) -> (i32, i32) {
    %c0_i32 = arith.constant 0 : i32
    %c0_i32_0 = arith.constant 0 : i32
    %c0_i32_1 = arith.constant 0 : i32
    return %c0_i32, %c0_i32_0 : i32, i32
  }
  func.func @transform_3(%arg0: i32) -> (i32, i32) {
    %c0_i32 = arith.constant 0 : i32
    %c0_i32_0 = arith.constant 0 : i32
    %c0_i32_1 = arith.constant 0 : i32
    return %c0_i32, %c0_i32_0 : i32, i32
  }
  func.func @transform_4(%arg0: i32) -> (i32, i32) {
    %c0_i32 = arith.constant 0 : i32
    %c0_i32_0 = arith.constant 0 : i32
    %c0_i32_1 = arith.constant 0 : i32
    return %c0_i32, %c0_i32_0 : i32, i32
  }
  func.func @transform_5(%arg0: i32) -> (i32, i32) {
    %c0_i32 = arith.constant 0 : i32
    %c0_i32_0 = arith.constant 0 : i32
    return %arg0, %c0_i32 : i32, i32
  }
}

</mosaic_0001>

<bundles_post_ra>
// kernel: highway_forward.1
= control target key start
LH: loop header
LB: loop body
LE: loop exit
PB: predicated region body
PF: predicated region fallthrough
CT: control target
= control target key end

     0   :  { %10 = vsyncpa [#allocation3], 0  ;;  %s375_s0 = inlined_call_operand.hbm [shape: f32[8,32], index: 0, kind: input, shape index: {}]   ;;  %s376_s1 = inlined_call_operand.hbm [shape: bf16[32,32], index: 1, kind: input, shape index: {}]   ;;  %s377_s2 = inlined_call_operand.vmem [shape: f32[1,32], index: 2, kind: input, shape index: {}]   ;;  %s378_s3 = inlined_call_operand.hbm [shape: bf16[32,32], index: 3, kind: input, shape index: {}]   ;;  %s379_s4 = inlined_call_operand.vmem [shape: f32[1,32], index: 4, kind: input, shape index: {}]   ;;  %s380_s5 = inlined_call_operand.hbm [shape: f32[8,32], index: 5, kind: output, shape index: {}]  }
   0x1   :  { %11 = vsyncpa [#allocation6], 0  ;;  %s28_s20 = sshll.u32 %s376_s1, 4  ;;  %s29_s20 = int_to_ptr.hbm [resolvable:$true] %s28_s20 }
   0x2   :  { %12 = vsyncpa [#allocation4], 0  ;;  %s318_s21 = smov [#allocation5]   ;;  %s18_s25 = sshll.u32 %s375_s0, 4  ;;  %s19_s25 = int_to_ptr.hbm [resolvable:$true] %s18_s25 }
   0x3   :  { %s30_s22 = sshll.u32 %s318_s21, 4  ;;  %s319_s26 = smov 64   ;;  %s31_s22 = int_to_ptr.vmem [resolvable:$true] %s30_s22 }
   0x4   :  { %s320_s27 = smov 4   ;;  %s321_s28 = smov [#allocation2]  }
   0x5   :  { %36 = dma.hbm_to_vmem [thread:$0]  %s29_s20, 256, %s31_s22, [#allocation6], %s319_s26, %s319_s26, %s320_s27  }
   0x6   :  { %s20_s29 = sshll.u32 %s321_s28, 4  ;;  %s43_s7 = sshll.u32 %s378_s3, 4  ;;  %s21_s29 = int_to_ptr.vmem [resolvable:$true] %s20_s29  ;;  %s44_s7 = int_to_ptr.hbm [resolvable:$true] %s43_s7 }
   0x7   :  { %23 = dma.hbm_to_vmem [thread:$0]  %s19_s25, 128, %s21_s29, [#allocation3]  }
   0x8   :  { %s322_s1 = smov [#allocation7]  }
   0x9   :  { %s45_s8 = sshll.u32 %s322_s1, 4  ;;  %s46_s8 = int_to_ptr.vmem [resolvable:$true] %s45_s8 }
   0xa   :  { %51 = dma.hbm_to_vmem [thread:$0]  %s44_s7, 256, %s46_s8, [#allocation6], %s319_s26, %s319_s26, %s320_s27  }
   0xb   :  { %312 = dma.done.wait [#allocation3], 128  }
   0xc   :  { %313 = vsyncadd [#allocation3], 4294967168 }
   0xd   :  { %314 = dma.done.wait [#allocation6], 512  }
   0xe   :  { %315 = vsyncadd [#allocation6], 4294966784  ;;  %v203_v0 = vld [vmem:[#allocation7 + $0x8] sm:$0xff]  ;;  %v201_v1 = vld [vmem:[#allocation5 + $0x8] sm:$0xff]  ;;  %vm89_vm0 = vcmask 261120   ;;  %s170_s13 = sshll.u32 %s380_s5, 4  ;;  %s171_s13 = int_to_ptr.hbm [resolvable:$true] %s170_s13 }
   0xf   :  { %133 = vmatpush.bf16.msra.mxu1 %v203_v0  ;;  %v202_v2 = vld [vmem:[#allocation7] sm:$0xff]  ;;  %v67_v3 = vld [vmem:[#allocation2] sm:$0xff]  ;;  %99 = vmatpush.bf16.msra.mxu0 %v201_v1  ;;  %v200_v4 = vld [vmem:[#allocation5] sm:$0xff] }
  0x10   :  { %v68_v5 = vpack.c.bf16 %v67_v3, %v67_v3  ;;  %v210_v6 = vld [vmem:[%s379_s4] ss:$0 sm:$0xff]  ;;  %s323_s4 = smov [#allocation8]  }
  0x11   :  { %v211_v15 = vld [vmem:[%s377_s2] ss:$0 sm:$0xff]  ;;  %s168_s11 = sshll.u32 %s323_s4, 4  ;;  %s169_s11 = int_to_ptr.vmem [resolvable:$true] %s168_s11 }
  0x13   :  { %134 = vmatpush.bf16.msra.mxu1 %v202_v2  ;;  %100 = vmatpush.bf16.msra.mxu0 %v200_v4 }
  0x16   :  { %198 = vmatmul.msk.bf16.vlgmr.msra.gmra.mxu1 %vm89_vm0, %v68_v5  ;;  %189 = vmatmul.msk.bf16.vlgmr.msra.gmra.mxu0 %vm89_vm0, %v68_v5 }
  0x93   :  { %v136_v7 = vpop.f32.mrf.mxu1  ;;  %v102_v9 = vpop.f32.mrf.mxu0 }
  0x94   :  { %v137_v8 = vadd.f32 %v210_v6, %v136_v7  ;;  %v103_v16 = vadd.f32 %v211_v15, %v102_v9 }
  0x96   :  { %v199_v10 = vmul.f32 -1.442695, %v137_v8  ;;  %v106_v20 = vmax.f32 %v103_v16, 0.0 }
  0x98   :  { %212 = vpow2.f32 %v199_v10  ;;  %v159_v25 = vsub.f32 %v106_v20, %v67_v3 }
  0x9b   :  { %v138_v11 = vpop.f32.mrf.mxu1  ;;  %v104_v12 = vpop.f32.mrf.mxu0 }
  0x9e   :  { %v213_v13 = vpop.eup %212 }
  0x9f   :  { %v143_v14 = vadd.f32 1.0, %v213_v13 }
  0xa1   :  { %214 = vrcp.f32 %v143_v14  ;;  %v155_v21 = vand.u32 2147483648, %v143_v14  ;;  %v153_v23 = vand.u32 2147483647, %v143_v14  ;;  %vm149_vm2 = vweird.f32 %v143_v14 }
  0xa3   :  { %v156_v26 = vor.u32 1.1754944e-38, %v155_v21  ;;  %vm154_vm4 = vcmp.eq.f32.partialorder %v153_v23, 8.507059e+37 }
  0xa7   :  { %v215_v17 = vpop.eup %214 }
  0xa8   :  { %v145_v18 = vmul.f32 %v215_v17, %v143_v14  ;;  %vm150_vm1 = vweird.f32 %v215_v17 }
  0xa9   :  { %vm151_vm3 = vmor %vm149_vm2, %vm150_vm1 }
  0xaa   :  { %v146_v19 = vsub.f32 1.0, %v145_v18 }
  0xac   :  { %v147_v22 = vmul.f32 %v215_v17, %v146_v19 }
  0xae   :  { %v148_v24 = vadd.f32 %v215_v17, %v147_v22 }
  0xb0   :  { %v152_v27 = vsel %vm151_vm3, %v215_v17, %v148_v24 }
  0xb1   :  { %v157_v28 = vsel %vm154_vm4, %v156_v26, %v152_v27 }
  0xb2   :  { %v160_v29 = vmul.f32 %v159_v25, %v157_v28 }
  0xb4   :  { %v161_v30 = vadd.f32 %v160_v29, %v67_v3 }
  0xb6   :  { %162 = vst.msk [vmem:[#allocation8] sm:$0xff] %vm89_vm0, %v161_v30 }
  0xb7   :  { %173 = dma.vmem_to_hbm [thread:$0]  %s169_s11, 128, %s171_s13, [#allocation4]  }
  0xb8   :  { %316 = dma.done.wait [#allocation4], 128  }
  0xb9   :  { %317 = vsyncadd [#allocation4], 4294967168 }
  0xba   :  { %178 = vsyncpa [#allocation3], 1 }
  0xbb   :  { %179 = vsyncpa [#allocation6], 1 }
  0xbc   :  { %180 = vsyncpa [#allocation4], 1 }

</bundles_post_ra>
